<compile_context>
chip_gen: v6e
topology: v6e:2x2x1
jax: 0.10.0
libtpu: 0.0.40
codegen_flags: <defaults>
</compile_context>

<pallas_src>
import functools

import jax
import jax.numpy as jnp
from jax.experimental import pallas as pl
from jax.experimental.pallas import tpu as pltpu


def _bottleneck_kernel(x_ref, kbd_ref, ksq_ref, vals_ref, out_ref, onehot_ref,
                       *, num_codebooks, keys_pad):
    """x:(TB,C*E)  kbd:(C*E,C*Kp)  ksq:(1,C*Kp)  vals:(C*Kp,Vp)  out:(TB,Vp)."""
    tb = x_ref.shape[0]
    kp = keys_pad

    # One fused MXU push (contraction C*E, width C*Kp) instead of C tiny dots.
    cross = jnp.dot(x_ref[...], kbd_ref[...],
                    preferred_element_type=jnp.float32)          # (TB, C*Kp) f32
    # ||k||^2 - 2 x.k : same argmin as the reference sqrt-L2 distance.
    dist = ksq_ref[...] - 2.0 * cross                            # (TB, C*Kp) f32

    # Hoisted iota (JAX does not CSE broadcasts).
    k_iota = jax.lax.broadcasted_iota(jnp.int32, (tb, kp), 1)

    for cb in range(num_codebooks):                              # static unroll, C small
        d_c = dist[:, cb * kp:(cb + 1) * kp]                     # 128-aligned lane slice
        min_val = jnp.min(d_c, axis=-1, keepdims=True)           # (TB, 1)
        # argmin with first-index tie-break (VPU + lane-reduce only).
        idx = jnp.min(jnp.where(d_c == min_val, k_iota, kp),
                      axis=-1, keepdims=True)                    # (TB, 1) int32
        onehot_ref[:, cb * kp:(cb + 1) * kp] = (k_iota == idx).astype(jnp.float32)

    # Fused gather + mean over codebooks: one MXU matmul, compile-time 1/C scale.
    out_ref[...] = jnp.dot(onehot_ref[...], vals_ref[...],
                           preferred_element_type=jnp.float32) * (1.0 / num_codebooks)


def _round_up(n, m):
    return ((n + m - 1) // m) * m


@functools.partial(jax.jit, static_argnames=("bf16_cross",))
def discrete_kv_bottleneck(batch_bce, keys, values, *, bf16_cross=False):
    """batch_bce: (B, C, E), keys: (C, K, E), values: (C, K, V) -> (B, V)."""
    B, C, E = batch_bce.shape
    _, K, V = values.shape
    Kp = _round_up(K, 128)     # per-codebook key columns, 128-aligned lane slices
    Vp = _round_up(V, 128)     # lane-dense output slab
    CE = C * E
    CKp = C * Kp

    # Streamed input: (B, C, E) -> (B, C*E). Row-major contiguous => free reshape,
    # no extra HBM round trip (the old jnp.pad of the batch is gone).
    x2 = batch_bce.reshape(B, CE).astype(jnp.float32)

    keys_f = keys.astype(jnp.float32)
    # Block-diagonal key matrix (C*E, C*Kp): column c*Kp+k holds keys[c, k] in
    # rows c*E:(c+1)*E. Static weights -> built once; padded key columns are 0.
    kbd = jnp.zeros((CE, CKp), jnp.float32)
    for c in range(C):
        kbd = kbd.at[c * E:(c + 1) * E, c * Kp:c * Kp + K].set(keys_f[c].T)

    # ||k||^2 per key; padded columns get +1e30 so they can never win the argmin.
    ksq = jnp.full((C, Kp), 1e30, jnp.float32)
    ksq = ksq.at[:, :K].set(jnp.sum(keys_f * keys_f, axis=-1))
    ksq = ksq.reshape(1, CKp)

    # Flattened lane-dense value table (C*Kp, Vp); padded rows/cols are zero.
    # Kept in f32 for exact value passthrough semantics.
    vals = jnp.zeros((C, Kp, Vp), jnp.float32)
    vals = vals.at[:, :K, :V].set(values.astype(jnp.float32))
    vals = vals.reshape(CKp, Vp)

    if bf16_cross:
        # bf16 MXU inputs for the cross term (native on v6e/v7x); ksq and the
        # value table stay f32.  Near-tie keys may flip the argmin vs. the f32
        # reference -> keep False when bit-exact code selection is required.
        x2 = x2.astype(jnp.bfloat16)
        kbd = kbd.astype(jnp.bfloat16)

    # Batch tile = MXU M dimension.  256 rows/step for production batches; for
    # tiny B use a single full block (grid overhead isn't worth it there).
    if B >= 256:
        TB = 256
    else:
        TB = B if B <= 8 else _round_up(B, 8)
    grid = (pl.cdiv(B, TB),)   # ragged last block handled by Pallas masked writeback

    # Explicit VMEM budget: resident weights + double-buffered x/out tiles +
    # one-hot scratch, with headroom.
    x_itemsize = 2 if bf16_cross else 4
    resident = kbd.size * x_itemsize + ksq.size * 4 + vals.size * 4
    streamed = 2 * (TB * CE * x_itemsize + TB * Vp * 4)
    scratch = TB * CKp * 4
    vmem_limit = int(min(max(2 * (resident + streamed + scratch), 16 << 20), 100 << 20))
    # TODO(synk): for production configs whose resident keys/values approach
    # v7x's 64 MiB VMEM, keep them bf16-resident or add a K-tiling grid axis
    # with a partial-argmin accumulator.

    kernel = functools.partial(_bottleneck_kernel, num_codebooks=C, keys_pad=Kp)
    out = pl.pallas_call(
        kernel,
        out_shape=jax.ShapeDtypeStruct((B, Vp), jnp.float32),
        grid_spec=pltpu.PrefetchScalarGridSpec(
            num_scalar_prefetch=0,
            grid=grid,
            in_specs=[
                pl.BlockSpec((TB, CE), lambda i: (i, 0)),    # streamed batch tile
                pl.BlockSpec((CE, CKp), lambda i: (0, 0)),   # resident block-diag keys
                pl.BlockSpec((1, CKp), lambda i: (0, 0)),    # resident ||k||^2
                pl.BlockSpec((CKp, Vp), lambda i: (0, 0)),   # resident value table
            ],
            out_specs=pl.BlockSpec((TB, Vp), lambda i: (i, 0)),
            scratch_shapes=[pltpu.VMEM((TB, CKp), jnp.float32)],  # flat one-hot slab
        ),
        compiler_params=pltpu.CompilerParams(
            dimension_semantics=("parallel",),   # batch axis -> v7x megacore
            vmem_limit_bytes=vmem_limit,
        ),
    )(x2, kbd, ksq, vals)
    return out[:, :V]


def _reference(batch_bce, keys, values):
    # Pure-JAX reference mirroring the PyTorch forward.
    B, C, _ = batch_bce.shape
    outs = []
    for b in range(B):
        mapped = []
        for c in range(C):
            diff = keys[c] - batch_bce[b, c][None, :]          # (K, E)
            dist = jnp.sqrt(jnp.sum(diff * diff, axis=-1))     # (K,)
            idx = jnp.argmin(dist)
            mapped.append(values[c][idx])                      # (V,)
        outs.append(jnp.mean(jnp.stack(mapped, axis=0), axis=0))
    return jnp.stack(outs, axis=0)


if __name__ == "__main__":
    # Small shapes consistent with the module.
    B, C, K, E, V = 2, 4, 64, 32, 16

    key = jax.random.PRNGKey(0)
    k_batch, k_keys, k_vals = jax.random.split(key, 3)

    # initialize_random_keys: uniform [0, 1)
    keys = jax.random.uniform(k_keys, (C, K, E), dtype=jnp.float32)
    # values: xavier_normal_ on a (C, K, V) tensor:
    #   fan_in = K * V, fan_out = C * V, std = sqrt(2 / (fan_in + fan_out))
    xavier_std = (2.0 / (K * V + C * V)) ** 0.5
    values = xavier_std * jax.random.normal(k_vals, (C, K, V), dtype=jnp.float32)
    # TODO(synk): encoder and requires_random_projection=True (rand_proj) paths
    # not implemented (config under test uses encoder=None, projection=False).

    # Input batch: each sample is (C, E), stacked -> (B, C, E).
    batch = jax.random.normal(k_batch, (B, C, E), dtype=jnp.float32)

    out = discrete_kv_bottleneck(batch, keys, values)
    out = jax.block_until_ready(out)

    ref = _reference(batch, keys, values)
    assert out.shape == (B, V), out.shape
    assert jnp.allclose(out, ref, atol=1e-5, rtol=1e-5), (
        f"mismatch: max abs diff {jnp.max(jnp.abs(out - ref))}")

    print("KERNEL_OK")
</pallas_src>

<mosaic_0001>
module attributes {stable_mosaic.version = 11 : i64} {
  func.func @_bottleneck_kernel(%arg0: i32, %arg1: memref<2x128xf32, #tpu.memory_space<vmem>>, %arg2: memref<128x512xf32, #tpu.memory_space<vmem>>, %arg3: memref<1x512xf32, #tpu.memory_space<vmem>>, %arg4: memref<512x128xf32, #tpu.memory_space<vmem>>, %arg5: memref<2x128xf32, #tpu.memory_space<vmem>>, %arg6: memref<2x512xf32, #tpu.memory_space<vmem>>) attributes {dimension_semantics = [#tpu.dimension_semantics<parallel>], iteration_bounds = array<i64: 1>, scalar_prefetch = 0 : i64, scratch_operands = 1 : i64, tpu.core_type = #tpu.core_type<tc>, window_params = [{transform_indices = @transform_0, window_bounds = array<i64: 2, 128>}, {pipeline_mode = #tpu.pipeline_mode<synchronous>, transform_indices = @transform_1, window_bounds = array<i64: 128, 512>}, {pipeline_mode = #tpu.pipeline_mode<synchronous>, transform_indices = @transform_2, window_bounds = array<i64: 1, 512>}, {pipeline_mode = #tpu.pipeline_mode<synchronous>, transform_indices = @transform_3, window_bounds = array<i64: 512, 128>}, {transform_indices = @transform_4, window_bounds = array<i64: 2, 128>}]} {
    %c0 = arith.constant 0 : index
    %c0_0 = arith.constant 0 : index
    %0 = vector.load %arg1[%c0, %c0_0] : memref<2x128xf32, #tpu.memory_space<vmem>>, vector<2x128xf32>
    %c0_1 = arith.constant 0 : index
    %c0_2 = arith.constant 0 : index
    %1 = vector.load %arg2[%c0_1, %c0_2] : memref<128x512xf32, #tpu.memory_space<vmem>>, vector<128x512xf32>
    %cst = arith.constant dense<0.000000e+00> : vector<2x512xf32>
    %2 = tpu.matmul %0, %1, %cst {dimension_numbers = #tpu.dot_dimension_numbers<[1], [0], [0], [1], [0, 0, 1, 1], [], []>} : vector<2x128xf32>, vector<128x512xf32>, vector<2x512xf32> -> vector<2x512xf32>
    %c0_3 = arith.constant 0 : index
    %c0_4 = arith.constant 0 : index
    %3 = vector.load %arg3[%c0_3, %c0_4] : memref<1x512xf32, #tpu.memory_space<vmem>>, vector<1x512xf32>
    %cst_5 = arith.constant 2.000000e+00 : f32
    %4 = vector.broadcast %cst_5 : f32 to vector<2x512xf32>
    %5 = arith.mulf %4, %2 : vector<2x512xf32>
    %6 = vector.broadcast %3 : vector<1x512xf32> to vector<2x512xf32>
    %7 = arith.subf %6, %5 : vector<2x512xf32>
    %8 = tpu.iota {dimensions = array<i32: 1>} : vector<2x128xi32>
    %9 = vector.extract_strided_slice %7 {offsets = [0, 0], sizes = [2, 128], strides = [1, 1]} : vector<2x512xf32> to vector<2x128xf32>
    %cst_6 = arith.constant dense<0x7F800000> : vector<2xf32>
    %10 = vector.multi_reduction <minimumf>, %9, %cst_6 [1] : vector<2x128xf32> to vector<2xf32>
    %11 = vector.shape_cast %10 : vector<2xf32> to vector<2x1xf32>
    %12 = vector.broadcast %11 : vector<2x1xf32> to vector<2x128xf32>
    %13 = arith.cmpf oeq, %9, %12 : vector<2x128xf32>
    %c128_i32 = arith.constant 128 : i32
    %14 = vector.broadcast %c128_i32 : i32 to vector<2x128xi32>
    %15 = arith.select %13, %8, %14 : vector<2x128xi1>, vector<2x128xi32>
    %cst_7 = arith.constant dense<2147483647> : vector<2xi32>
    %16 = vector.multi_reduction <minsi>, %15, %cst_7 [1] : vector<2x128xi32> to vector<2xi32>
    %17 = vector.shape_cast %16 : vector<2xi32> to vector<2x1xi32>
    %18 = vector.broadcast %17 : vector<2x1xi32> to vector<2x128xi32>
    %19 = arith.cmpi eq, %8, %18 : vector<2x128xi32>
    %20 = arith.extui %19 : vector<2x128xi1> to vector<2x128xi32>
    %21 = arith.sitofp %20 : vector<2x128xi32> to vector<2x128xf32>
    %c0_8 = arith.constant 0 : index
    %c0_9 = arith.constant 0 : index
    %22 = vector.load %arg6[%c0_8, %c0_9] : memref<2x512xf32, #tpu.memory_space<vmem>>, vector<2x128xf32>
    tpu.vector_store %arg6[%c0_8, %c0_9], %21 {strides = array<i32>} : memref<2x512xf32, #tpu.memory_space<vmem>>, vector<2x128xf32>,
    %23 = vector.extract_strided_slice %7 {offsets = [0, 128], sizes = [2, 128], strides = [1, 1]} : vector<2x512xf32> to vector<2x128xf32>
    %cst_10 = arith.constant dense<0x7F800000> : vector<2xf32>
    %24 = vector.multi_reduction <minimumf>, %23, %cst_10 [1] : vector<2x128xf32> to vector<2xf32>
    %25 = vector.shape_cast %24 : vector<2xf32> to vector<2x1xf32>
    %26 = vector.broadcast %25 : vector<2x1xf32> to vector<2x128xf32>
    %27 = arith.cmpf oeq, %23, %26 : vector<2x128xf32>
    %c128_i32_11 = arith.constant 128 : i32
    %28 = vector.broadcast %c128_i32_11 : i32 to vector<2x128xi32>
    %29 = arith.select %27, %8, %28 : vector<2x128xi1>, vector<2x128xi32>
    %cst_12 = arith.constant dense<2147483647> : vector<2xi32>
    %30 = vector.multi_reduction <minsi>, %29, %cst_12 [1] : vector<2x128xi32> to vector<2xi32>
    %31 = vector.shape_cast %30 : vector<2xi32> to vector<2x1xi32>
    %32 = vector.broadcast %31 : vector<2x1xi32> to vector<2x128xi32>
    %33 = arith.cmpi eq, %8, %32 : vector<2x128xi32>
    %34 = arith.extui %33 : vector<2x128xi1> to vector<2x128xi32>
    %35 = arith.sitofp %34 : vector<2x128xi32> to vector<2x128xf32>
    %c0_13 = arith.constant 0 : index
    %c128 = arith.constant 128 : index
    %36 = vector.load %arg6[%c0_13, %c128] : memref<2x512xf32, #tpu.memory_space<vmem>>, vector<2x128xf32>
    tpu.vector_store %arg6[%c0_13, %c128], %35 {strides = array<i32>} : memref<2x512xf32, #tpu.memory_space<vmem>>, vector<2x128xf32>,
    %37 = vector.extract_strided_slice %7 {offsets = [0, 256], sizes = [2, 128], strides = [1, 1]} : vector<2x512xf32> to vector<2x128xf32>
    %cst_14 = arith.constant dense<0x7F800000> : vector<2xf32>
    %38 = vector.multi_reduction <minimumf>, %37, %cst_14 [1] : vector<2x128xf32> to vector<2xf32>
    %39 = vector.shape_cast %38 : vector<2xf32> to vector<2x1xf32>
    %40 = vector.broadcast %39 : vector<2x1xf32> to vector<2x128xf32>
    %41 = arith.cmpf oeq, %37, %40 : vector<2x128xf32>
    %c128_i32_15 = arith.constant 128 : i32
    %42 = vector.broadcast %c128_i32_15 : i32 to vector<2x128xi32>
    %43 = arith.select %41, %8, %42 : vector<2x128xi1>, vector<2x128xi32>
    %cst_16 = arith.constant dense<2147483647> : vector<2xi32>
    %44 = vector.multi_reduction <minsi>, %43, %cst_16 [1] : vector<2x128xi32> to vector<2xi32>
    %45 = vector.shape_cast %44 : vector<2xi32> to vector<2x1xi32>
    %46 = vector.broadcast %45 : vector<2x1xi32> to vector<2x128xi32>
    %47 = arith.cmpi eq, %8, %46 : vector<2x128xi32>
    %48 = arith.extui %47 : vector<2x128xi1> to vector<2x128xi32>
    %49 = arith.sitofp %48 : vector<2x128xi32> to vector<2x128xf32>
    %c0_17 = arith.constant 0 : index
    %c256 = arith.constant 256 : index
    %50 = vector.load %arg6[%c0_17, %c256] : memref<2x512xf32, #tpu.memory_space<vmem>>, vector<2x128xf32>
    tpu.vector_store %arg6[%c0_17, %c256], %49 {strides = array<i32>} : memref<2x512xf32, #tpu.memory_space<vmem>>, vector<2x128xf32>,
    %51 = vector.extract_strided_slice %7 {offsets = [0, 384], sizes = [2, 128], strides = [1, 1]} : vector<2x512xf32> to vector<2x128xf32>
    %cst_18 = arith.constant dense<0x7F800000> : vector<2xf32>
    %52 = vector.multi_reduction <minimumf>, %51, %cst_18 [1] : vector<2x128xf32> to vector<2xf32>
    %53 = vector.shape_cast %52 : vector<2xf32> to vector<2x1xf32>
    %54 = vector.broadcast %53 : vector<2x1xf32> to vector<2x128xf32>
    %55 = arith.cmpf oeq, %51, %54 : vector<2x128xf32>
    %c128_i32_19 = arith.constant 128 : i32
    %56 = vector.broadcast %c128_i32_19 : i32 to vector<2x128xi32>
    %57 = arith.select %55, %8, %56 : vector<2x128xi1>, vector<2x128xi32>
    %cst_20 = arith.constant dense<2147483647> : vector<2xi32>
    %58 = vector.multi_reduction <minsi>, %57, %cst_20 [1] : vector<2x128xi32> to vector<2xi32>
    %59 = vector.shape_cast %58 : vector<2xi32> to vector<2x1xi32>
    %60 = vector.broadcast %59 : vector<2x1xi32> to vector<2x128xi32>
    %61 = arith.cmpi eq, %8, %60 : vector<2x128xi32>
    %62 = arith.extui %61 : vector<2x128xi1> to vector<2x128xi32>
    %63 = arith.sitofp %62 : vector<2x128xi32> to vector<2x128xf32>
    %c0_21 = arith.constant 0 : index
    %c384 = arith.constant 384 : index
    %64 = vector.load %arg6[%c0_21, %c384] : memref<2x512xf32, #tpu.memory_space<vmem>>, vector<2x128xf32>
    tpu.vector_store %arg6[%c0_21, %c384], %63 {strides = array<i32>} : memref<2x512xf32, #tpu.memory_space<vmem>>, vector<2x128xf32>,
    %c0_22 = arith.constant 0 : index
    %c0_23 = arith.constant 0 : index
    %65 = vector.load %arg6[%c0_22, %c0_23] : memref<2x512xf32, #tpu.memory_space<vmem>>, vector<2x512xf32>
    %c0_24 = arith.constant 0 : index
    %c0_25 = arith.constant 0 : index
    %66 = vector.load %arg4[%c0_24, %c0_25] : memref<512x128xf32, #tpu.memory_space<vmem>>, vector<512x128xf32>
    %cst_26 = arith.constant dense<0.000000e+00> : vector<2x128xf32>
    %67 = tpu.matmul %65, %66, %cst_26 {dimension_numbers = #tpu.dot_dimension_numbers<[1], [0], [0], [1], [0, 0, 1, 1], [], []>} : vector<2x512xf32>, vector<512x128xf32>, vector<2x128xf32> -> vector<2x128xf32>
    %cst_27 = arith.constant 2.500000e-01 : f32
    %68 = vector.broadcast %cst_27 : f32 to vector<2x128xf32>
    %69 = arith.mulf %67, %68 : vector<2x128xf32>
    %c0_28 = arith.constant 0 : index
    %c0_29 = arith.constant 0 : index
    %70 = vector.load %arg5[%c0_28, %c0_29] : memref<2x128xf32, #tpu.memory_space<vmem>>, vector<2x128xf32>
    tpu.vector_store %arg5[%c0_28, %c0_29], %69 {strides = array<i32>} : memref<2x128xf32, #tpu.memory_space<vmem>>, vector<2x128xf32>,
    return
  }
  func.func @transform_0(%arg0: i32) -> (i32, i32) {
    %c0_i32 = arith.constant 0 : i32
    %c0_i32_0 = arith.constant 0 : i32
    return %arg0, %c0_i32 : i32, i32
  }
  func.func @transform_1(%arg0: i32) -> (i32, i32) {
    %c0_i32 = arith.constant 0 : i32
    %c0_i32_0 = arith.constant 0 : i32
    %c0_i32_1 = arith.constant 0 : i32
    return %c0_i32, %c0_i32_0 : i32, i32
  }
  func.func @transform_2(%arg0: i32) -> (i32, i32) {
    %c0_i32 = arith.constant 0 : i32
    %c0_i32_0 = arith.constant 0 : i32
    %c0_i32_1 = arith.constant 0 : i32
    return %c0_i32, %c0_i32_0 : i32, i32
  }
  func.func @transform_3(%arg0: i32) -> (i32, i32) {
    %c0_i32 = arith.constant 0 : i32
    %c0_i32_0 = arith.constant 0 : i32
    %c0_i32_1 = arith.constant 0 : i32
    return %c0_i32, %c0_i32_0 : i32, i32
  }
  func.func @transform_4(%arg0: i32) -> (i32, i32) {
    %c0_i32 = arith.constant 0 : i32
    %c0_i32_0 = arith.constant 0 : i32
    return %arg0, %c0_i32 : i32, i32
  }
}

</mosaic_0001>

<bundles_post_ra>
// kernel: discrete_kv_bottleneck.1
= control target key start
LH: loop header
LB: loop body
LE: loop exit
PB: predicated region body
PF: predicated region fallthrough
CT: control target
= control target key end

     0   :  { %s1165_s0 = inlined_call_operand.vmem [shape: f32[2,128], index: 0, kind: input, shape index: {}]   ;;  %s1166_s1 = inlined_call_operand.vmem [shape: f32[128,512], index: 1, kind: input, shape index: {}]   ;;  %s1167_s2 = inlined_call_operand.vmem [shape: f32[1,512], index: 2, kind: input, shape index: {}]   ;;  %s1168_s3 = inlined_call_operand.vmem [shape: f32[512,128], index: 3, kind: input, shape index: {}]   ;;  %s1169_s4 = inlined_call_operand.hbm [shape: f32[2,128], index: 4, kind: output, shape index: {}]  }
   0x1   :  { %v80_v0 = vld [vmem:[%s1166_s1 + $0x1e8] sm:$0xff]  ;;  %v82_v1 = vld [vmem:[%s1166_s1 + $0x1f8] sm:$0xff]  ;;  %v79_v2 = vld [vmem:[%s1166_s1 + $0x1e0] sm:$0xff] }
   0x2   :  { %83 = vmatprep.subr.mxu0 %v80_v0  ;;  %154 = vmatprep.subr.mxu1 %v82_v1  ;;  %v81_v3 = vld [vmem:[%s1166_s1 + $0x1f0] sm:$0xff]  ;;  %v76_v4 = vld [vmem:[%s1166_s1 + $0x1c8] sm:$0xff]  ;;  %v78_v5 = vld [vmem:[%s1166_s1 + $0x1d8] sm:$0xff] }
   0x3   :  { %84 = vmatpush1.msra.mxu0 %v79_v2  ;;  %155 = vmatpush1.msra.mxu1 %v81_v3  ;;  %v75_v6 = vld [vmem:[%s1166_s1 + $0x1c0] sm:$0xff]  ;;  %v77_v7 = vld [vmem:[%s1166_s1 + $0x1d0] sm:$0xff]  ;;  %v72_v8 = vld [vmem:[%s1166_s1 + $0x1a8] sm:$0xff] }
   0x4   :  { %85 = vmatprep.subr.mxu0 %v76_v4  ;;  %156 = vmatprep.subr.mxu1 %v78_v5  ;;  %v74_v9 = vld [vmem:[%s1166_s1 + $0x1b8] sm:$0xff]  ;;  %v71_v10 = vld [vmem:[%s1166_s1 + $0x1a0] sm:$0xff]  ;;  %v73_v11 = vld [vmem:[%s1166_s1 + $0x1b0] sm:$0xff] }
   0x5   :  { %86 = vmatpush1.msra.mxu0 %v75_v6  ;;  %157 = vmatpush1.msra.mxu1 %v77_v7  ;;  %v68_v12 = vld [vmem:[%s1166_s1 + $0x188] sm:$0xff]  ;;  %v70_v13 = vld [vmem:[%s1166_s1 + $0x198] sm:$0xff]  ;;  %v67_v14 = vld [vmem:[%s1166_s1 + $0x180] sm:$0xff] }
   0x6   :  { %87 = vmatprep.subr.mxu0 %v72_v8  ;;  %158 = vmatprep.subr.mxu1 %v74_v9  ;;  %v69_v15 = vld [vmem:[%s1166_s1 + $0x190] sm:$0xff]  ;;  %v64_v16 = vld [vmem:[%s1166_s1 + $0x168] sm:$0xff]  ;;  %v66_v17 = vld [vmem:[%s1166_s1 + $0x178] sm:$0xff] }
   0x7   :  { %88 = vmatpush1.msra.mxu0 %v71_v10  ;;  %159 = vmatpush1.msra.mxu1 %v73_v11  ;;  %v63_v18 = vld [vmem:[%s1166_s1 + $0x160] sm:$0xff]  ;;  %v65_v19 = vld [vmem:[%s1166_s1 + $0x170] sm:$0xff]  ;;  %v60_v20 = vld [vmem:[%s1166_s1 + $0x148] sm:$0xff] }
   0x8   :  { %89 = vmatprep.subr.mxu0 %v68_v12  ;;  %160 = vmatprep.subr.mxu1 %v70_v13  ;;  %v62_v21 = vld [vmem:[%s1166_s1 + $0x158] sm:$0xff]  ;;  %v59_v22 = vld [vmem:[%s1166_s1 + $0x140] sm:$0xff]  ;;  %v61_v23 = vld [vmem:[%s1166_s1 + $0x150] sm:$0xff] }
   0x9   :  { %90 = vmatpush1.msra.mxu0 %v67_v14  ;;  %161 = vmatpush1.msra.mxu1 %v69_v15  ;;  %v56_v24 = vld [vmem:[%s1166_s1 + $0x128] sm:$0xff]  ;;  %v58_v25 = vld [vmem:[%s1166_s1 + $0x138] sm:$0xff]  ;;  %v55_v26 = vld [vmem:[%s1166_s1 + $0x120] sm:$0xff] }
   0xa   :  { %91 = vmatprep.subr.mxu0 %v64_v16  ;;  %162 = vmatprep.subr.mxu1 %v66_v17  ;;  %v57_v27 = vld [vmem:[%s1166_s1 + $0x130] sm:$0xff]  ;;  %v52_v28 = vld [vmem:[%s1166_s1 + $0x108] sm:$0xff]  ;;  %v54_v29 = vld [vmem:[%s1166_s1 + $0x118] sm:$0xff] }
   0xb   :  { %92 = vmatpush1.msra.mxu0 %v63_v18  ;;  %163 = vmatpush1.msra.mxu1 %v65_v19  ;;  %v51_v30 = vld [vmem:[%s1166_s1 + $0x100] sm:$0xff]  ;;  %v53_v31 = vld [vmem:[%s1166_s1 + $0x110] sm:$0xff]  ;;  %v48_v32 = vld [vmem:[%s1166_s1 + $0xe8] sm:$0xff] }
   0xc   :  { %93 = vmatprep.subr.mxu0 %v60_v20  ;;  %164 = vmatprep.subr.mxu1 %v62_v21  ;;  %v50_v33 = vld [vmem:[%s1166_s1 + $0xf8] sm:$0xff]  ;;  %v47_v34 = vld [vmem:[%s1166_s1 + $0xe0] sm:$0xff]  ;;  %v49_v35 = vld [vmem:[%s1166_s1 + $0xf0] sm:$0xff] }
   0xd   :  { %94 = vmatpush1.msra.mxu0 %v59_v22  ;;  %165 = vmatpush1.msra.mxu1 %v61_v23  ;;  %v44_v36 = vld [vmem:[%s1166_s1 + $0xc8] sm:$0xff]  ;;  %v46_v37 = vld [vmem:[%s1166_s1 + $0xd8] sm:$0xff]  ;;  %v43_v38 = vld [vmem:[%s1166_s1 + $0xc0] sm:$0xff] }
   0xe   :  { %95 = vmatprep.subr.mxu0 %v56_v24  ;;  %166 = vmatprep.subr.mxu1 %v58_v25  ;;  %v45_v39 = vld [vmem:[%s1166_s1 + $0xd0] sm:$0xff]  ;;  %v40_v40 = vld [vmem:[%s1166_s1 + $0xa8] sm:$0xff]  ;;  %v42_v41 = vld [vmem:[%s1166_s1 + $0xb8] sm:$0xff] }
   0xf   :  { %96 = vmatpush1.msra.mxu0 %v55_v26  ;;  %167 = vmatpush1.msra.mxu1 %v57_v27  ;;  %v39_v42 = vld [vmem:[%s1166_s1 + $0xa0] sm:$0xff]  ;;  %v41_v43 = vld [vmem:[%s1166_s1 + $0xb0] sm:$0xff]  ;;  %v36_v44 = vld [vmem:[%s1166_s1 + $0x88] sm:$0xff] }
  0x10   :  { %97 = vmatprep.subr.mxu0 %v52_v28  ;;  %168 = vmatprep.subr.mxu1 %v54_v29  ;;  %v38_v45 = vld [vmem:[%s1166_s1 + $0x98] sm:$0xff]  ;;  %v35_v46 = vld [vmem:[%s1166_s1 + $0x80] sm:$0xff]  ;;  %v37_v47 = vld [vmem:[%s1166_s1 + $0x90] sm:$0xff] }
  0x11   :  { %98 = vmatpush1.msra.mxu0 %v51_v30  ;;  %169 = vmatpush1.msra.mxu1 %v53_v31 }
  0x12   :  { %99 = vmatprep.subr.mxu0 %v48_v32  ;;  %170 = vmatprep.subr.mxu1 %v50_v33 }
  0x13   :  { %100 = vmatpush1.msra.mxu0 %v47_v34  ;;  %171 = vmatpush1.msra.mxu1 %v49_v35 }
  0x14   :  { %101 = vmatprep.subr.mxu0 %v44_v36  ;;  %172 = vmatprep.subr.mxu1 %v46_v37 }
  0x15   :  { %102 = vmatpush1.msra.mxu0 %v43_v38  ;;  %173 = vmatpush1.msra.mxu1 %v45_v39 }
  0x16   :  { %103 = vmatprep.subr.mxu0 %v40_v40  ;;  %174 = vmatprep.subr.mxu1 %v42_v41 }
  0x17   :  { %9 = vsyncpa [#allocation4], 0  ;;  %104 = vmatpush1.msra.mxu0 %v39_v42  ;;  %175 = vmatpush1.msra.mxu1 %v41_v43  ;;  %v32_v48 = vld [vmem:[%s1166_s1 + $0x68] sm:$0xff]  ;;  %v34_v49 = vld [vmem:[%s1166_s1 + $0x78] sm:$0xff]  ;;  %v697_v1 = vmov 0.0   ;;  %v231_v2 = vlaneseq  ;;  %vm257_vm0 = vcmask 1041408  }
  0x18   :  { %105 = vmatprep.subr.mxu0 %v36_v44  ;;  %176 = vmatprep.subr.mxu1 %v38_v45  ;;  %v31_v50 = vld [vmem:[%s1166_s1 + $0x60] sm:$0xff]  ;;  %v33_v51 = vld [vmem:[%s1166_s1 + $0x70] sm:$0xff]  ;;  %v28_v52 = vld [vmem:[%s1166_s1 + $0x48] sm:$0xff] }
  0x19   :  { %106 = vmatpush1.msra.mxu0 %v35_v46  ;;  %177 = vmatpush1.msra.mxu1 %v37_v47  ;;  %v30_v53 = vld [vmem:[%s1166_s1 + $0x58] sm:$0xff]  ;;  %v27_v54 = vld [vmem:[%s1166_s1 + $0x40] sm:$0xff]  ;;  %v29_v55 = vld [vmem:[%s1166_s1 + $0x50] sm:$0xff]  ;;  %v922_v3 = vshrl.u32 %v231_v2, 7  ;;  %v935_v29 = vand.u32 127, %v231_v2 }
  0x1a   :  { %107 = vmatprep.subr.mxu0 %v32_v48  ;;  %178 = vmatprep.subr.mxu1 %v34_v49  ;;  %v24_v56 = vld [vmem:[%s1166_s1 + $0x28] sm:$0xff]  ;;  %v26_v57 = vld [vmem:[%s1166_s1 + $0x38] sm:$0xff]  ;;  %v23_v58 = vld [vmem:[%s1166_s1 + $0x20] sm:$0xff] }
  0x1b   :  { %108 = vmatpush1.msra.mxu0 %v31_v50  ;;  %179 = vmatpush1.msra.mxu1 %v33_v51  ;;  %v25_v59 = vld [vmem:[%s1166_s1 + $0x30] sm:$0xff]  ;;  %v20_v60 = vld [vmem:[%s1166_s1 + $0x8] sm:$0xff]  ;;  %v22_v61 = vld [vmem:[%s1166_s1 + $0x18] sm:$0xff]  ;;  %v241_v4 = vsub.s32 2, %v922_v3  ;;  %v233_v5 = vsub.s32 0, %v922_v3  ;;  %v245_v7 = vsub.s32 3, %v922_v3 }
  0x1c   :  { %109 = vmatprep.subr.mxu0 %v28_v52  ;;  %180 = vmatprep.subr.mxu1 %v30_v53  ;;  %v19_v62 = vld [vmem:[%s1166_s1] sm:$0xff]  ;;  %v21_v63 = vld [vmem:[%s1166_s1 + $0x10] sm:$0xff]  ;;  %v237_v8 = vsub.s32 1, %v922_v3  ;;  %v386_v50 = vld [vmem:[%s1168_s3 + $0xf8] sm:$0xff] }
  0x1d   :  { %110 = vmatpush1.msra.mxu0 %v27_v54  ;;  %181 = vmatpush1.msra.mxu1 %v29_v55  ;;  %v18_v0 = vld [vmem:[%s1165_s0] sm:$0x3]  ;;  %v370_v51 = vld [vmem:[%s1168_s3 + $0x78] sm:$0xff]  ;;  %v385_v52 = vld [vmem:[%s1168_s3 + $0xf0] sm:$0xff] }
  0x1e   :  { %111 = vmatprep.subr.mxu0 %v24_v56  ;;  %182 = vmatprep.subr.mxu1 %v26_v57  ;;  %v225_v6 = vld [vmem:[%s1167_s2] sm:$0xf]  ;;  %v418_v53 = vld [vmem:[%s1168_s3 + $0x1f8] sm:$0xff]  ;;  %v369_v54 = vld [vmem:[%s1168_s3 + $0x70] sm:$0xff] }
  0x1f   :  { %112 = vmatpush1.msra.mxu0 %v23_v58  ;;  %183 = vmatpush1.msra.mxu1 %v25_v59  ;;  %v242_v9 = vrot.slane %v225_v6, %v241_v4  ;;  %v234_v10 = vrot.slane %v225_v6, %v233_v5  ;;  %v246_v15 = vrot.slane %v225_v6, %v245_v7  ;;  %v402_v55 = vld [vmem:[%s1168_s3 + $0x178] sm:$0xff]  ;;  %v384_v56 = vld [vmem:[%s1168_s3 + $0xe8] sm:$0xff]  ;;  %v417_v57 = vld [vmem:[%s1168_s3 + $0x1f0] sm:$0xff] }
  0x20   :  { %113 = vmatprep.subr.mxu0 %v20_v60  ;;  %184 = vmatprep.subr.mxu1 %v22_v61  ;;  %v238_v16 = vrot.slane %v225_v6, %v237_v8 }
  0x21   :  { %114 = vmatpush1.msra.mxu0 %v19_v62  ;;  %147 = vmatprep.mubr.f32.mxu0 %v697_v1 }
  0x22   :  { %185 = vmatpush1.msra.mxu1 %v21_v63  ;;  %218 = vmatprep.mubr.f32.mxu1 %v697_v1 }
  0x23   :  { %148 = vmatmul.mubr.f32.vlgmr.msra.gmra.mxu0 %v18_v0  ;;  %219 = vmatmul.mubr.f32.vlgmr.msra.gmra.mxu1 %v18_v0 }
  0x24   :  { %601 = vmatprep.subr.mxu0 %v386_v50  ;;  %636 = vmatprep.subr.mxu1 %v418_v53  ;;  %v392_v50 = vld [vmem:[%s1168_s3 + $0x128] sm:$0xff]  ;;  %v358_v53 = vld [vmem:[%s1168_s3 + $0x18] sm:$0xff] }
  0x25   :  { %602 = vmatpush3.msra.mxu0 %v370_v51  ;;  %637 = vmatpush3.msra.mxu1 %v402_v55  ;;  %v374_v51 = vld [vmem:[%s1168_s3 + $0x98] sm:$0xff]  ;;  %v373_v55 = vld [vmem:[%s1168_s3 + $0x90] sm:$0xff] }
  0x26   :  { %603 = vmatprep.subr.mxu0 %v385_v52  ;;  %638 = vmatprep.subr.mxu1 %v417_v57  ;;  %v407_v52 = vld [vmem:[%s1168_s3 + $0x1a0] sm:$0xff]  ;;  %v357_v57 = vld [vmem:[%s1168_s3 + $0x10] sm:$0xff] }
  0x27   :  { %604 = vmatpush3.msra.mxu0 %v369_v54  ;;  %v391_v54 = vld [vmem:[%s1168_s3 + $0x120] sm:$0xff] }
  0x28   :  { %605 = vmatprep.subr.mxu0 %v384_v56  ;;  %v406_v56 = vld [vmem:[%s1168_s3 + $0x198] sm:$0xff] }
  0xe3   :  { %v149_v11 = vpop.f32.mrf.mxu0  ;;  %v220_v12 = vpop.f32.mrf.mxu1 }
  0xe4   :  { %v226_v13 = vmul.f32 2.0, %v149_v11  ;;  %v228_v14 = vmul.f32 2.0, %v220_v12  ;;  %v368_v12 = vld [vmem:[%s1168_s3 + $0x68] sm:$0xff] }
  0xe5   :  { %v151_v17 = vpop.f32.mrf.mxu0  ;;  %v222_v18 = vpop.f32.mrf.mxu1  ;;  %606 = vmatpush3.msra.mxu0 %v368_v12 }
  0xe6   :  { %v227_v19 = vmul.f32 2.0, %v151_v17  ;;  %v229_v20 = vmul.f32 2.0, %v222_v18  ;;  %v253_v21 = vsub.f32 %v242_v9, %v228_v14  ;;  %v251_v22 = vsub.f32 %v234_v10, %v226_v13  ;;  %v401_v13 = vld [vmem:[%s1168_s3 + $0x170] sm:$0xff]  ;;  %v383_v14 = vld [vmem:[%s1168_s3 + $0xe0] sm:$0xff]  ;;  %v400_v17 = vld [vmem:[%s1168_s3 + $0x168] sm:$0xff] }
  0xe7   :  { %639 = vmatpush3.msra.mxu1 %v401_v13  ;;  %607 = vmatprep.subr.mxu0 %v383_v14  ;;  %v382_v18 = vld [vmem:[%s1168_s3 + $0xd8] sm:$0xff] }
  0xe8   :  { %v306_v23 = vsel %vm257_vm0, %v253_v21, inf  ;;  %v258_v24 = vsel %vm257_vm0, %v251_v22, inf  ;;  %v254_v25 = vsub.f32 %v246_v15, %v229_v20  ;;  %v252_v26 = vsub.f32 %v238_v16, %v227_v19  ;;  %v416_v15 = vld [vmem:[%s1168_s3 + $0x1e8] sm:$0xff]  ;;  %v367_v16 = vld [vmem:[%s1168_s3 + $0x60] sm:$0xff]  ;;  %v366_v20 = vld [vmem:[%s1168_s3 + $0x58] sm:$0xff] }
  0xe9   :  { %307 = vmin.xlane.f32.xlu1 %v306_v23  ;;  %259 = vmin.xlane.f32.xlu0 %v258_v24  ;;  %v415_v19 = vld [vmem:[%s1168_s3 + $0x1e0] sm:$0xff]  ;;  %v414_v23 = vld [vmem:[%s1168_s3 + $0x1d8] sm:$0xff]  ;;  %v365_v24 = vld [vmem:[%s1168_s3 + $0x50] sm:$0xff] }
  0xea   :  { %v330_v27 = vsel %vm257_vm0, %v254_v25, inf  ;;  %v282_v28 = vsel %vm257_vm0, %v252_v26, inf  ;;  %640 = vmatprep.subr.mxu1 %v416_v15  ;;  %608 = vmatpush3.msra.mxu0 %v367_v16 }
  0xeb   :  { %641 = vmatpush3.msra.mxu1 %v400_v17  ;;  %609 = vmatprep.subr.mxu0 %v382_v18 }
  0xec   :  { %642 = vmatprep.subr.mxu1 %v415_v19  ;;  %610 = vmatpush3.msra.mxu0 %v366_v20 }
  0xed   :  { %331 = vmin.xlane.f32.xlu1 %v330_v27  ;;  %283 = vmin.xlane.f32.xlu0 %v282_v28  ;;  %v413_v27 = vld [vmem:[%s1168_s3 + $0x1d0] sm:$0xff]  ;;  %v364_v28 = vld [vmem:[%s1168_s3 + $0x48] sm:$0xff] }
 0x172   :  { %v308_v30 = vpop.xlane.xlu1 %307  ;;  %v260_v31 = vpop.xlane.xlu0 %259 }
 0x173   :  { %vm309_vm1 = vcmp.eq.f32.partialorder %v253_v21, %v308_v30  ;;  %vm261_vm2 = vcmp.eq.f32.partialorder %v251_v22, %v260_v31  ;;  %v399_v21 = vld [vmem:[%s1168_s3 + $0x160] sm:$0xff]  ;;  %v381_v22 = vld [vmem:[%s1168_s3 + $0xd0] sm:$0xff] }
 0x174   :  { %v310_v32 = vsel %vm309_vm1, %v935_v29, 128  ;;  %v262_v33 = vsel %vm261_vm2, %v935_v29, 128  ;;  %643 = vmatpush3.msra.mxu1 %v399_v21  ;;  %611 = vmatprep.subr.mxu0 %v381_v22  ;;  %v397_v30 = vld [vmem:[%s1168_s3 + $0x150] sm:$0xff]  ;;  %v379_v31 = vld [vmem:[%s1168_s3 + $0xc0] sm:$0xff] }
 0x175   :  { %v311_v34 = vsel %vm257_vm0, %v310_v32, 2147483647  ;;  %v263_v35 = vsel %vm257_vm0, %v262_v33, 2147483647  ;;  %644 = vmatprep.subr.mxu1 %v414_v23  ;;  %612 = vmatpush3.msra.mxu0 %v365_v24  ;;  %v412_v32 = vld [vmem:[%s1168_s3 + $0x1c8] sm:$0xff]  ;;  %v363_v33 = vld [vmem:[%s1168_s3 + $0x40] sm:$0xff] }
 0x176   :  { %v332_v36 = vpop.xlane.xlu1 %331  ;;  %v284_v37 = vpop.xlane.xlu0 %283  ;;  %v265_v38 = vshra.s32 %v263_v35, 16  ;;  %v313_v42 = vshra.s32 %v311_v34, 16  ;;  %v264_v58 = vand.u32 65535, %v263_v35  ;;  %v312_v62 = vand.u32 65535, %v311_v34  ;;  %v396_v34 = vld [vmem:[%s1168_s3 + $0x148] sm:$0xff]  ;;  %v378_v35 = vld [vmem:[%s1168_s3 + $0xb8] sm:$0xff] }
 0x177   :  { %vm333_vm3 = vcmp.eq.f32.partialorder %v254_v25, %v332_v36  ;;  %vm285_vm4 = vcmp.eq.f32.partialorder %v252_v26, %v284_v37  ;;  %v398_v25 = vld [vmem:[%s1168_s3 + $0x158] sm:$0xff]  ;;  %v380_v26 = vld [vmem:[%s1168_s3 + $0xc8] sm:$0xff]  ;;  %v411_v36 = vld [vmem:[%s1168_s3 + $0x1c0] sm:$0xff] }
 0x178   :  { %v334_v39 = vsel %vm333_vm3, %v935_v29, 128  ;;  %v286_v40 = vsel %vm285_vm4, %v935_v29, 128  ;;  %v267_v41 = vcvt.s32.f32 %v265_v38  ;;  %v315_v46 = vcvt.s32.f32 %v313_v42  ;;  %645 = vmatpush3.msra.mxu1 %v398_v25  ;;  %613 = vmatprep.subr.mxu0 %v380_v26  ;;  %v362_v37 = vld [vmem:[%s1168_s3 + $0x38] sm:$0xff]  ;;  %v395_v38 = vld [vmem:[%s1168_s3 + $0x140] sm:$0xff] }
 0x179   :  { %v335_v43 = vsel %vm257_vm0, %v334_v39, 2147483647  ;;  %v287_v44 = vsel %vm257_vm0, %v286_v40, 2147483647  ;;  %v266_v60 = vcvt.s32.f32 %v264_v58  ;;  %v314_v5 = vcvt.s32.f32 %v312_v62  ;;  %646 = vmatprep.subr.mxu1 %v413_v27  ;;  %614 = vmatpush3.msra.mxu0 %v364_v28  ;;  %v377_v39 = vld [vmem:[%s1168_s3 + $0xb0] sm:$0xff]  ;;  %v410_v40 = vld [vmem:[%s1168_s3 + $0x1b8] sm:$0xff] }
 0x17a   :  { %268 = vmin.xlane.f32.xlu0 %v267_v41  ;;  %v289_v45 = vshra.s32 %v287_v44, 16  ;;  %v337_v48 = vshra.s32 %v335_v43, 16  ;;  %v288_v61 = vand.u32 65535, %v287_v44  ;;  %v336_v6 = vand.u32 65535, %v335_v43  ;;  %647 = vmatpush3.msra.mxu1 %v397_v30  ;;  %v394_v42 = vld [vmem:[%s1168_s3 + $0x138] sm:$0xff]  ;;  %v376_v43 = vld [vmem:[%s1168_s3 + $0xa8] sm:$0xff] }
 0x17b   :  { %615 = vmatprep.subr.mxu0 %v379_v31  ;;  %648 = vmatprep.subr.mxu1 %v412_v32  ;;  %v409_v44 = vld [vmem:[%s1168_s3 + $0x1b0] sm:$0xff]  ;;  %v390_v58 = vld [vmem:[%s1168_s3 + $0x118] sm:$0xff]  ;;  %v356_v62 = vld [vmem:[%s1168_s3 + $0x8] sm:$0xff]  ;;  %v698_v31 = vmov 1983009808  }
 0x17c   :  { %v291_v47 = vcvt.s32.f32 %v289_v45  ;;  %v339_v49 = vcvt.s32.f32 %v337_v48  ;;  %v290_v4 = vcvt.s32.f32 %v288_v61  ;;  %v338_v10 = vcvt.s32.f32 %v336_v6  ;;  %616 = vmatpush3.msra.mxu0 %v363_v33  ;;  %649 = vmatpush3.msra.mxu1 %v396_v34  ;;  %v360_v45 = vld [vmem:[%s1168_s3 + $0x28] sm:$0xff]  ;;  %v405_v61 = vld [vmem:[%s1168_s3 + $0x190] sm:$0xff]  ;;  %v355_v6 = vld [vmem:[%s1168_s3] sm:$0xff] }
 0x17d   :  { %617 = vmatprep.subr.mxu0 %v378_v35  ;;  %650 = vmatprep.subr.mxu1 %v411_v36  ;;  %v408_v48 = vld [vmem:[%s1168_s3 + $0x1a8] sm:$0xff]  ;;  %v422_v32 = vunpack.c.l.s4 %v698_v31 }
 0x17e   :  { %316 = vmin.xlane.f32.xlu0 %v315_v46  ;;  %292 = vmin.xlane.f32.xlu1 %v291_v47 }
 0x17f   :  { %618 = vmatpush3.msra.mxu0 %v362_v37  ;;  %651 = vmatpush3.msra.mxu1 %v395_v38  ;;  %v423_v34 = vunpack.c.0.s8 %v422_v32 }
 0x180   :  { %619 = vmatprep.subr.mxu0 %v377_v39  ;;  %652 = vmatprep.subr.mxu1 %v410_v40 }
 0x181   :  { %653 = vmatpush3.msra.mxu1 %v394_v42  ;;  %v426_v35 = vsub.s32 %v423_v34, %v922_v3 }
 0x182   :  { %340 = vmin.xlane.f32.xlu1 %v339_v49  ;;  %654 = vmatprep.subr.mxu1 %v409_v44 }
 0x203   :  { %v969_v59 = vpop.xlane.xlu0 %268 }
 0x204   :  { %vm270_vm5 = vcmp.eq.f32.partialorder %v267_v41, %v969_v59  ;;  %v361_v41 = vld [vmem:[%s1168_s3 + $0x30] sm:$0xff] }
 0x205   :  { %v271_v63 = vsel %vm270_vm5, %v266_v60, inf  ;;  %620 = vmatpush3.msra.mxu0 %v361_v41  ;;  %v372_v60 = vld [vmem:[%s1168_s3 + $0x88] sm:$0xff] }
 0x206   :  { %272 = vmin.xlane.f32.xlu0 %v271_v63  ;;  %621 = vmatprep.subr.mxu0 %v376_v43  ;;  %v389_v63 = vld [vmem:[%s1168_s3 + $0x110] sm:$0xff] }
 0x207   :  { %v972_v0 = vpop.xlane.xlu1 %292  ;;  %v974_v2 = vpop.xlane.xlu0 %316  ;;  %622 = vmatpush3.msra.mxu0 %v360_v45 }
 0x208   :  { %vm294_vm6 = vcmp.eq.f32.partialorder %v291_v47, %v972_v0  ;;  %vm318_vm7 = vcmp.eq.f32.partialorder %v315_v46, %v974_v2  ;;  %v393_v46 = vld [vmem:[%s1168_s3 + $0x130] sm:$0xff]  ;;  %v375_v47 = vld [vmem:[%s1168_s3 + $0xa0] sm:$0xff]  ;;  %v299_v12 = vcvt.f32.s32 %v972_v0  ;;  %v323_v13 = vcvt.f32.s32 %v974_v2 }
 0x209   :  { %v295_v7 = vsel %vm294_vm6, %v290_v4, inf  ;;  %v319_v8 = vsel %vm318_vm7, %v314_v5, inf  ;;  %655 = vmatpush3.msra.mxu1 %v393_v46  ;;  %623 = vmatprep.subr.mxu0 %v375_v47  ;;  %v371_v4 = vld [vmem:[%s1168_s3 + $0x80] sm:$0xff]  ;;  %v404_v5 = vld [vmem:[%s1168_s3 + $0x188] sm:$0xff] }
 0x20a   :  { %296 = vmin.xlane.f32.xlu1 %v295_v7  ;;  %320 = vmin.xlane.f32.xlu0 %v319_v8  ;;  %v388_v7 = vld [vmem:[%s1168_s3 + $0x108] sm:$0xff]  ;;  %v403_v8 = vld [vmem:[%s1168_s3 + $0x180] sm:$0xff]  ;;  %v300_v18 = vshll.u32 %v299_v12, 16  ;;  %v324_v19 = vshll.u32 %v323_v13, 16 }
 0x20b   :  { %v978_v9 = vpop.xlane.xlu1 %340  ;;  %656 = vmatprep.subr.mxu1 %v408_v48 }
 0x20c   :  { %vm342_vm8 = vcmp.eq.f32.partialorder %v339_v49, %v978_v9  ;;  %v359_v49 = vld [vmem:[%s1168_s3 + $0x20] sm:$0xff]  ;;  %657 = vmatpush3.msra.mxu1 %v392_v50  ;;  %v347_v22 = vcvt.f32.s32 %v978_v9 }
 0x20d   :  { %v343_v11 = vsel %vm342_vm8, %v338_v10, inf  ;;  %624 = vmatpush3.msra.mxu0 %v359_v49  ;;  %658 = vmatprep.subr.mxu1 %v407_v52  ;;  %v387_v10 = vld [vmem:[%s1168_s3 + $0x100] sm:$0xff]  ;;  %s699_s3 = smov [#allocation3]  }
 0x20e   :  { %344 = vmin.xlane.f32.xlu1 %v343_v11  ;;  %625 = vmatprep.subr.mxu0 %v374_v51  ;;  %v275_v11 = vcvt.f32.s32 %v969_v59  ;;  %v348_v26 = vshll.u32 %v347_v22, 16  ;;  %s589_s26 = sshll.u32 %s699_s3, 4  ;;  %s590_s26 = int_to_ptr.vmem [resolvable:$true] %s589_s26 }
 0x20f   :  { %626 = vmatpush3.msra.mxu0 %v358_v53  ;;  %659 = vmatpush3.msra.mxu1 %v391_v54  ;;  %s675_s27 = scalar_lea.vmem %s590_s26, 32  ;;  %p680_p1 = scmp.lt.s32.totalorder %s590_s26, %s590_s26 }
 0x210   :  { %627 = vmatprep.subr.mxu0 %v373_v55  ;;  %660 = vmatprep.subr.mxu1 %v406_v56  ;;  %v276_v15 = vshll.u32 %v275_v11, 16  ;;  %p676_p0 = scmp.ne.s32.totalorder %s590_s26, %s675_s27  ;;  %p681_p2 = scmp.lt.s32.totalorder %s675_s27, %s675_s27 }
 0x211   :  { %628 = vmatpush3.msra.mxu0 %v357_v57  ;;  %661 = vmatpush3.msra.mxu1 %v390_v58 }
 0x212   :  { %629 = vmatprep.subr.mxu0 %v372_v60  ;;  %662 = vmatprep.subr.mxu1 %v405_v61  ;;  %p682_p3 = por %p681_p2, %p680_p1 }
 0x213   :  { %630 = vmatpush3.msra.mxu0 %v356_v62  ;;  %663 = vmatpush3.msra.mxu1 %v389_v63 }
 0x214   :  { %631 = vmatprep.subr.mxu0 %v371_v4  ;;  %664 = vmatprep.subr.mxu1 %v404_v5  ;;  %p683_p4 = pnand %p682_p3, %p676_p0 }
 0x215   :  { %632 = vmatpush3.msra.mxu0 %v355_v6  ;;  %665 = vmatpush3.msra.mxu1 %v388_v7 }
 0x216   :  { %666 = vmatprep.subr.mxu1 %v403_v8 }
 0x217   :  { %667 = vmatpush3.msra.mxu1 %v387_v10 }
 0x28f   :  { %v273_v14 = vpop.xlane.xlu0 %272 }
 0x290   :  { %v274_v16 = vcvt.f32.s32 %v273_v14 }
 0x292   :  { %v277_v17 = vadd.s32 %v276_v15, %v274_v16 }
 0x293   :  { %v297_v20 = vpop.xlane.xlu1 %296  ;;  %v321_v21 = vpop.xlane.xlu0 %320 }
 0x294   :  { %vm278_vm9 = vcmp.eq.s32.totalorder %v935_v29, %v277_v17  ;;  %v298_v23 = vcvt.f32.s32 %v297_v20  ;;  %v322_v24 = vcvt.f32.s32 %v321_v21 }
 0x295   :  { %v597_v59 = vsel %vm278_vm9, 1.0, %v697_v1 }
 0x296   :  { %281 = vst [vmem:[#allocation2] sm:$0x3] %v597_v59  ;;  %v301_v0 = vadd.s32 %v300_v18, %v298_v23  ;;  %v325_v25 = vadd.s32 %v324_v19, %v322_v24 }
 0x297   :  { %v345_v2 = vpop.xlane.xlu1 %344 }
 0x298   :  { %vm302_vm10 = vcmp.eq.s32.totalorder %v935_v29, %v301_v0  ;;  %vm326_vm11 = vcmp.eq.s32.totalorder %v935_v29, %v325_v25  ;;  %v346_v27 = vcvt.f32.s32 %v345_v2 }
 0x299   :  { %v598_v28 = vsel %vm302_vm10, 1.0, %v697_v1  ;;  %v599_v9 = vsel %vm326_vm11, 1.0, %v697_v1 }
 0x29a   :  { %305 = vst [vmem:[#allocation2 + $0x2] sm:$0x3] %v598_v28  ;;  %329 = vst [vmem:[#allocation2 + $0x4] sm:$0x3] %v599_v9  ;;  %v349_v30 = vadd.s32 %v348_v26, %v346_v27 }
 0x29c   :  { %vm350_vm12 = vcmp.eq.s32.totalorder %v935_v29, %v349_v30 }
 0x29d   :  { %v600_v33 = vsel %vm350_vm12, 1.0, %v697_v1 }
 0x29e   :  { %353 = vst [vmem:[#allocation2 + $0x6] sm:$0x3] %v600_v33 }
 0x2a5   :  { %v354_v36 = vld [vmem:[#allocation2] sm:$0xff] }
 0x2a6   :  { %v427_v37 = vrot.slane %v354_v36, %v426_v35  ;;  %v420_v38 = vcombine.high %v354_v36, %v354_v36 }
 0x2a8   :  { %v435_v39 = vcombine.high %v427_v37, %v427_v37  ;;  %v434_v40 = vrot.slane %v420_v38, %v426_v35 }
 0x2aa   :  { %505 = vmatprep.mubr.f32.mxu0 %v435_v39  ;;  %v436_v41 = vcombine.high %v434_v40, %v434_v40 }
 0x2ab   :  { %506 = vmatmul.mubr.f32.vlgmr.msra.gmra.mxu0 %v427_v37 }
 0x2ac   :  { %575 = vmatprep.mubr.f32.mxu1 %v436_v41 }
 0x2ad   :  { %576 = vmatmul.mubr.f32.vlgmr.msra.gmra.mxu1 %v434_v40 }
 0x36b   :  { %v633_v42 = vpop.f32.mrf.mxu0 }
 0x36d   :  { %v634_v43 = vpop.f32.mrf.mxu0  ;;  %v668_v44 = vpop.f32.mrf.mxu1 }
 0x36e   :  { %v635_v45 = vadd.f32 %v634_v43, %v633_v42 }
 0x36f   :  { %v669_v29 = vpop.f32.mrf.mxu1 }
 0x370   :  { %v670_v1 = vadd.f32 %v669_v29, %v668_v44 }
 0x372   :  { %v578_v46 = vadd.f32 %v670_v1, %v635_v45 }
 0x374   :  { %v581_v3 = vmul.f32 0.25, %v578_v46 }
 0x376   :  { %582 = vst [vmem:[#allocation3] sm:$0x3] %v581_v3 }
 0x377   :  { %686 = shalt.err (!%p683_p4)
}
 0x378   :  { %592 = dma.vmem_to_hbm [thread:$0]  %s590_s26, 32, %s1169_s4, [#allocation4]  }
 0x379   :  { %695 = dma.done.wait [#allocation4], 32  }
 0x37a   :  { %696 = vsyncadd [#allocation4], 4294967264 }
 0x37b   :  { %596 = vsyncpa [#allocation4], 1 }

</bundles_post_ra>
